<compile_context>
chip_gen: v6e
topology: v6e:2x2x1
jax: 0.10.0
libtpu: 0.0.40
codegen_flags: <defaults>
</compile_context>

<pallas_src>
import functools

import jax
import jax.numpy as jnp
import numpy as np
from jax.experimental import pallas as pl
from jax.experimental.pallas import tpu as pltpu

HIDDEN = 100          # logical hidden width (PyTorch fc1 out_features)
HP = 128              # lane-padded hidden width
OUT_W = 128           # packed output slab width: mean cols [0,A), std cols [A,2A)


def _mlp_policy_kernel(x_ref, w1_ref, wh_ref, b_ref, o_ref, *, action_dim):
    b = b_ref[...]                       # (2, 128): row 0 = b1, row 1 = packed head bias

    # fc1 + ReLU, lane-dense hidden width 128 (cols 100..127 are zero padding,
    # so they stay 0 through the ReLU and contribute nothing downstream).
    h = jnp.dot(x_ref[...], w1_ref[...], preferred_element_type=jnp.float32)
    h = jnp.maximum(h + b[0:1, :], 0.0)

    # Both heads fused into a single lane-dense (128, 128) matmul:
    # z[:, :A] = mean pre-activation, z[:, A:2A] = std pre-activation.
    z = jnp.dot(h, wh_ref[...], preferred_element_type=jnp.float32) + b[1:2, :]

    col = jax.lax.broadcasted_iota(jnp.int32, z.shape, 1)
    is_mean = col < action_dim

    mean = jnp.tanh(z)
    # Numerically stable softplus: max(x, 0) + log1p(exp(-|x|)), then + 1e-5.
    std = jnp.maximum(z, 0.0) + jnp.log1p(jnp.exp(-jnp.abs(z))) + 1e-5

    o_ref[...] = jnp.where(is_mean, mean, std)


def pack_params(w1, b1, wm, bm, ws, bs):
    """Pad / pack logical params into lane-dense kernel params (done once).

    w1: (D, 100), b1: (100,), wm/ws: (100, A), bm/bs: (A,)
    Returns w1p (D, 128), whp (128, 128), bp (2, 128).
    """
    D, H = w1.shape
    A = wm.shape[1]
    assert H <= HP, f"hidden={H} exceeds lane-padded width {HP}"
    assert 2 * A <= OUT_W, f"2*action_dim={2*A} exceeds packed output width {OUT_W}"

    w1p = jnp.zeros((D, HP), jnp.float32).at[:, :H].set(w1)
    whp = jnp.zeros((HP, OUT_W), jnp.float32)
    whp = whp.at[:H, :A].set(wm)
    whp = whp.at[:H, A:2 * A].set(ws)
    bp = jnp.zeros((2, OUT_W), jnp.float32)
    bp = bp.at[0, :H].set(b1)
    bp = bp.at[1, :A].set(bm)
    bp = bp.at[1, A:2 * A].set(bs)
    return w1p, whp, bp


def _round_up(x, m):
    return ((x + m - 1) // m) * m


def mlp_policy_forward(x, w1p, whp, bp, action_dim):
    """x: (B, state_dim) f32 -> (mean (B, A), std (B, A)) f32."""
    B, D = x.shape

    # Batch tiling:
    #  * large B: 1024-row tiles (amortizes per-step overhead; working set
    #    x(1024xD) + out(1024x128) + resident weights << VMEM on all gens),
    #  * B >= 16: cap the tile so the grid has >= 2 steps (keeps both v7x
    #    TensorCores busy),
    #  * tiny B: one minimal tile.
    TARGET_TILE = 1024
    if B < 16:
        tile_b = _round_up(max(B, 8), 8)
    else:
        tile_b = min(TARGET_TILE, _round_up(pl.cdiv(B, 2), 8))
    b_pad = _round_up(B, tile_b)
    if b_pad != B:
        x = jnp.pad(x, ((0, b_pad - B), (0, 0)))

    kernel = functools.partial(_mlp_policy_kernel, action_dim=action_dim)

    out = pl.pallas_call(
        kernel,
        out_shape=jax.ShapeDtypeStruct((b_pad, OUT_W), jnp.float32),
        grid_spec=pltpu.PrefetchScalarGridSpec(
            num_scalar_prefetch=0,
            grid=(b_pad // tile_b,),
            in_specs=[
                pl.BlockSpec((tile_b, D), lambda i: (i, 0)),     # x tile
                pl.BlockSpec((D, HP), lambda i: (0, 0)),         # W1 (VMEM-resident)
                pl.BlockSpec((HP, OUT_W), lambda i: (0, 0)),     # packed head W
                pl.BlockSpec((2, OUT_W), lambda i: (0, 0)),      # packed biases
            ],
            out_specs=pl.BlockSpec((tile_b, OUT_W), lambda i: (i, 0)),
        ),
        compiler_params=pltpu.CompilerParams(
            dimension_semantics=("parallel",)),
    )(x, w1p, whp, bp)

    mean = out[:B, :action_dim]
    std = out[:B, action_dim:2 * action_dim]
    return mean, std


def init_params(key, state_dim, action_dim, hidden=HIDDEN):
    k1, k2, k3, k4, k5, k6 = jax.random.split(key, 6)
    # fc1 weight: kaiming_normal_ (fan_in, relu gain) -> std = sqrt(2/fan_in)
    w1 = jax.random.normal(k1, (state_dim, hidden), jnp.float32) * np.sqrt(2.0 / state_dim)
    # PyTorch Linear bias default: U(-1/sqrt(fan_in), 1/sqrt(fan_in))
    bnd1 = 1.0 / np.sqrt(state_dim)
    b1 = jax.random.uniform(k2, (hidden,), jnp.float32, -bnd1, bnd1)
    # Heads: xavier_normal_ -> std = sqrt(2/(fan_in+fan_out))
    stdh = np.sqrt(2.0 / (hidden + action_dim))
    bndh = 1.0 / np.sqrt(hidden)
    wm = jax.random.normal(k3, (hidden, action_dim), jnp.float32) * stdh
    bm = jax.random.uniform(k4, (action_dim,), jnp.float32, -bndh, bndh)
    ws = jax.random.normal(k5, (hidden, action_dim), jnp.float32) * stdh
    bs = jax.random.uniform(k6, (action_dim,), jnp.float32, -bndh, bndh)
    return w1, b1, wm, bm, ws, bs


def _reference(x, w1, b1, wm, bm, ws, bs):
    h = jnp.maximum(x @ w1 + b1, 0.0)
    mean = jnp.tanh(h @ wm + bm)
    std = jax.nn.softplus(h @ ws + bs) + 1e-5
    return mean, std


if __name__ == "__main__":
    state_dim = 32
    action_dim = 4

    key = jax.random.PRNGKey(0)
    kx, kx2, kp = jax.random.split(key, 3)

    w1, b1, wm, bm, ws, bs = init_params(kp, state_dim, action_dim)
    w1p, whp, bp = pack_params(w1, b1, wm, bm, ws, bs)

    # Case 1: tiny batch (single-tile latency path).
    x = jax.random.normal(kx, (8, state_dim), jnp.float32)
    mean, std = mlp_policy_forward(x, w1p, whp, bp, action_dim)
    mean, std = jax.block_until_ready((mean, std))
    mean_ref, std_ref = _reference(x, w1, b1, wm, bm, ws, bs)
    np.testing.assert_allclose(np.asarray(mean), np.asarray(mean_ref), rtol=1e-4, atol=1e-4)
    np.testing.assert_allclose(np.asarray(std), np.asarray(std_ref), rtol=1e-4, atol=1e-4)
    assert mean.shape == (8, action_dim) and std.shape == (8, action_dim)
    assert bool(jnp.all(std > 0.0))

    # Case 2: non-multiple-of-tile batch (exercises >=2 grid steps + padding).
    x2 = jax.random.normal(kx2, (40, state_dim), jnp.float32)
    mean2, std2 = mlp_policy_forward(x2, w1p, whp, bp, action_dim)
    mean2, std2 = jax.block_until_ready((mean2, std2))
    mean2_ref, std2_ref = _reference(x2, w1, b1, wm, bm, ws, bs)
    np.testing.assert_allclose(np.asarray(mean2), np.asarray(mean2_ref), rtol=1e-4, atol=1e-4)
    np.testing.assert_allclose(np.asarray(std2), np.asarray(std2_ref), rtol=1e-4, atol=1e-4)
    assert mean2.shape == (40, action_dim) and std2.shape == (40, action_dim)
    assert bool(jnp.all(std2 > 0.0))

    # TODO(synk): choose_action's Normal sampling stays host/JAX-side
    # (mean + std * jax.random.normal(...)); only forward() is kernelized.
    print("KERNEL_OK")
</pallas_src>

<mosaic_0001>
module attributes {stable_mosaic.version = 11 : i64} {
  func.func @_mlp_policy_kernel(%arg0: i32, %arg1: memref<8x32xf32, #tpu.memory_space<vmem>>, %arg2: memref<32x128xf32, #tpu.memory_space<vmem>>, %arg3: memref<128x128xf32, #tpu.memory_space<vmem>>, %arg4: memref<2x128xf32, #tpu.memory_space<vmem>>, %arg5: memref<8x128xf32, #tpu.memory_space<vmem>>) attributes {dimension_semantics = [#tpu.dimension_semantics<parallel>], iteration_bounds = array<i64: 1>, scalar_prefetch = 0 : i64, scratch_operands = 0 : i64, tpu.core_type = #tpu.core_type<tc>, window_params = [{transform_indices = @transform_0, window_bounds = array<i64: 8, 32>}, {pipeline_mode = #tpu.pipeline_mode<synchronous>, transform_indices = @transform_1, window_bounds = array<i64: 32, 128>}, {pipeline_mode = #tpu.pipeline_mode<synchronous>, transform_indices = @transform_2, window_bounds = array<i64: 128, 128>}, {pipeline_mode = #tpu.pipeline_mode<synchronous>, transform_indices = @transform_3, window_bounds = array<i64: 2, 128>}, {transform_indices = @transform_4, window_bounds = array<i64: 8, 128>}]} {
    %c0 = arith.constant 0 : index
    %c0_0 = arith.constant 0 : index
    %0 = vector.load %arg4[%c0, %c0_0] : memref<2x128xf32, #tpu.memory_space<vmem>>, vector<2x128xf32>
    %c0_1 = arith.constant 0 : index
    %c0_2 = arith.constant 0 : index
    %1 = vector.load %arg1[%c0_1, %c0_2] : memref<8x32xf32, #tpu.memory_space<vmem>>, vector<8x32xf32>
    %c0_3 = arith.constant 0 : index
    %c0_4 = arith.constant 0 : index
    %2 = vector.load %arg2[%c0_3, %c0_4] : memref<32x128xf32, #tpu.memory_space<vmem>>, vector<32x128xf32>
    %cst = arith.constant dense<0.000000e+00> : vector<8x128xf32>
    %3 = tpu.matmul %1, %2, %cst {dimension_numbers = #tpu.dot_dimension_numbers<[1], [0], [0], [1], [0, 0, 1, 1], [], []>} : vector<8x32xf32>, vector<32x128xf32>, vector<8x128xf32> -> vector<8x128xf32>
    %4 = vector.extract_strided_slice %0 {offsets = [0, 0], sizes = [1, 128], strides = [1, 1]} : vector<2x128xf32> to vector<1x128xf32>
    %5 = vector.broadcast %4 : vector<1x128xf32> to vector<8x128xf32>
    %6 = arith.addf %3, %5 : vector<8x128xf32>
    %cst_5 = arith.constant 0.000000e+00 : f32
    %7 = vector.broadcast %cst_5 : f32 to vector<8x128xf32>
    %8 = arith.maximumf %6, %7 : vector<8x128xf32>
    %c0_6 = arith.constant 0 : index
    %c0_7 = arith.constant 0 : index
    %9 = vector.load %arg3[%c0_6, %c0_7] : memref<128x128xf32, #tpu.memory_space<vmem>>, vector<128x128xf32>
    %cst_8 = arith.constant dense<0.000000e+00> : vector<8x128xf32>
    %10 = tpu.matmul %8, %9, %cst_8 {dimension_numbers = #tpu.dot_dimension_numbers<[1], [0], [0], [1], [0, 0, 1, 1], [], []>} : vector<8x128xf32>, vector<128x128xf32>, vector<8x128xf32> -> vector<8x128xf32>
    %11 = vector.extract_strided_slice %0 {offsets = [1, 0], sizes = [1, 128], strides = [1, 1]} : vector<2x128xf32> to vector<1x128xf32>
    %12 = vector.broadcast %11 : vector<1x128xf32> to vector<8x128xf32>
    %13 = arith.addf %10, %12 : vector<8x128xf32>
    %14 = tpu.iota {dimensions = array<i32: 1>} : vector<8x128xi32>
    %c4_i32 = arith.constant 4 : i32
    %15 = vector.broadcast %c4_i32 : i32 to vector<8x128xi32>
    %16 = arith.cmpi slt, %14, %15 : vector<8x128xi32>
    %17 = math.tanh %13 : vector<8x128xf32>
    %cst_9 = arith.constant 0.000000e+00 : f32
    %18 = vector.broadcast %cst_9 : f32 to vector<8x128xf32>
    %19 = arith.maximumf %13, %18 : vector<8x128xf32>
    %20 = math.absf %13 : vector<8x128xf32>
    %cst_10 = arith.constant 0.000000e+00 : f32
    %21 = vector.broadcast %cst_10 : f32 to vector<8x128xf32>
    %22 = arith.subf %21, %20 : vector<8x128xf32>
    %23 = math.exp %22 : vector<8x128xf32>
    %24 = math.log1p %23 : vector<8x128xf32>
    %25 = arith.addf %19, %24 : vector<8x128xf32>
    %cst_11 = arith.constant 9.99999974E-6 : f32
    %26 = vector.broadcast %cst_11 : f32 to vector<8x128xf32>
    %27 = arith.addf %25, %26 : vector<8x128xf32>
    %28 = arith.select %16, %17, %27 : vector<8x128xi1>, vector<8x128xf32>
    %c0_12 = arith.constant 0 : index
    %c0_13 = arith.constant 0 : index
    %29 = vector.load %arg5[%c0_12, %c0_13] : memref<8x128xf32, #tpu.memory_space<vmem>>, vector<8x128xf32>
    tpu.vector_store %arg5[%c0_12, %c0_13], %28 {strides = array<i32>} : memref<8x128xf32, #tpu.memory_space<vmem>>, vector<8x128xf32>,
    return
  }
  func.func @transform_0(%arg0: i32) -> (i32, i32) {
    %c0_i32 = arith.constant 0 : i32
    %c0_i32_0 = arith.constant 0 : i32
    return %arg0, %c0_i32 : i32, i32
  }
  func.func @transform_1(%arg0: i32) -> (i32, i32) {
    %c0_i32 = arith.constant 0 : i32
    %c0_i32_0 = arith.constant 0 : i32
    %c0_i32_1 = arith.constant 0 : i32
    return %c0_i32, %c0_i32_0 : i32, i32
  }
  func.func @transform_2(%arg0: i32) -> (i32, i32) {
    %c0_i32 = arith.constant 0 : i32
    %c0_i32_0 = arith.constant 0 : i32
    %c0_i32_1 = arith.constant 0 : i32
    return %c0_i32, %c0_i32_0 : i32, i32
  }
  func.func @transform_3(%arg0: i32) -> (i32, i32) {
    %c0_i32 = arith.constant 0 : i32
    %c0_i32_0 = arith.constant 0 : i32
    %c0_i32_1 = arith.constant 0 : i32
    return %c0_i32, %c0_i32_0 : i32, i32
  }
  func.func @transform_4(%arg0: i32) -> (i32, i32) {
    %c0_i32 = arith.constant 0 : i32
    %c0_i32_0 = arith.constant 0 : i32
    return %arg0, %c0_i32 : i32, i32
  }
}

</mosaic_0001>

<bundles_post_ra>
// kernel: tpu_custom_call.1
= control target key start
LH: loop header
LB: loop body
LE: loop exit
PB: predicated region body
PF: predicated region fallthrough
CT: control target
= control target key end

     0   :  { %9 = vsyncpa [#allocation3], 0  ;;  %s509_s0 = inlined_call_operand.hbm [shape: f32[8,32], index: 0, kind: input, shape index: {}]   ;;  %s510_s1 = inlined_call_operand.hbm [shape: f32[32,128], index: 1, kind: input, shape index: {}]   ;;  %s511_s2 = inlined_call_operand.hbm [shape: f32[128,128], index: 2, kind: input, shape index: {}]   ;;  %s512_s3 = inlined_call_operand.vmem [shape: f32[2,128], index: 3, kind: input, shape index: {}]   ;;  %s513_s4 = inlined_call_operand.hbm [shape: f32[8,128], index: 4, kind: output, shape index: {}]  }
   0x1   :  { %10 = vsyncpa [#allocation6], 0 }
   0x2   :  { %11 = vsyncpa [#allocation4], 0  ;;  %s439_s15 = smov [#allocation5]  }
   0x3   :  { %s27_s16 = sshll.u32 %s439_s15, 4  ;;  %s28_s16 = int_to_ptr.vmem [resolvable:$true] %s27_s16 }
   0x4   :  { %s361_s17 = scalar_lea.vmem %s28_s16, 512  ;;  %p366_p1 = scmp.lt.s32.totalorder %s28_s16, %s28_s16 }
   0x5   :  { %p362_p0 = scmp.ne.s32.totalorder %s28_s16, %s361_s17  ;;  %p367_p2 = scmp.lt.s32.totalorder %s361_s17, %s361_s17 }
   0x7   :  { %p368_p3 = por %p367_p2, %p366_p1 }
   0x9   :  { %p369_p4 = pnand %p368_p3, %p362_p0 }
   0xb   :  { %372 = shalt.err (!%p369_p4)
}
   0xc   :  { %s440_s18 = smov 128   ;;  %s441_s19 = smov 8  }
   0xd   :  { %33 = dma.hbm_to_vmem [thread:$0]  %s510_s1, 512, %s28_s16, [#allocation6], %s440_s18, %s440_s18, %s441_s19  }
   0xe   :  { %s442_s22 = smov [#allocation2]   ;;  %s443_s24 = smov [#allocation7]  }
   0xf   :  { %s18_s23 = sshll.u32 %s442_s22, 4  ;;  %s39_s25 = sshll.u32 %s443_s24, 4  ;;  %s19_s23 = int_to_ptr.vmem [resolvable:$true] %s18_s23  ;;  %s40_s25 = int_to_ptr.vmem [resolvable:$true] %s39_s25 }
  0x10   :  { %s381_s26 = scalar_lea.vmem %s19_s23, 128  ;;  %p386_p6 = scmp.lt.s32.totalorder %s19_s23, %s19_s23 }
  0x11   :  { %p382_p5 = scmp.ne.s32.totalorder %s19_s23, %s381_s26  ;;  %p387_p7 = scmp.lt.s32.totalorder %s381_s26, %s381_s26 }
  0x13   :  { %p388_p8 = por %p387_p7, %p386_p6 }
  0x15   :  { %p389_p9 = pnand %p388_p8, %p382_p5 }
  0x17   :  { %392 = shalt.err (!%p389_p9)
}
  0x18   :  { %21 = dma.hbm_to_vmem [thread:$0]  %s509_s0, 128, %s19_s23, [#allocation3]  }
  0x19   :  { %s401_s29 = scalar_lea.vmem %s40_s25, 2048  ;;  %p406_p11 = scmp.lt.s32.totalorder %s40_s25, %s40_s25 }
  0x1a   :  { %p402_p10 = scmp.ne.s32.totalorder %s40_s25, %s401_s29  ;;  %p407_p12 = scmp.lt.s32.totalorder %s401_s29, %s401_s29 }
  0x1c   :  { %p408_p13 = por %p407_p12, %p406_p11 }
  0x1e   :  { %p409_p0 = pnand %p408_p13, %p402_p10 }
  0x20   :  { %412 = shalt.err (!%p409_p0)
}
  0x21   :  { %45 = dma.hbm_to_vmem [thread:$0]  %s511_s2, 2048, %s40_s25, [#allocation6], %s440_s18, %s440_s18, %s441_s19  }
  0x22   :  { %433 = dma.done.wait [#allocation3], 128  }
  0x23   :  { %434 = vsyncadd [#allocation3], 4294967168 }
  0x24   :  { %435 = dma.done.wait [#allocation6], 2560  }
  0x25   :  { %436 = vsyncadd [#allocation6], 4294964736  ;;  %v444_v0 = vmov 0.0   ;;  %vm445_vm0 = vmmov 0   ;;  %v62_v1 = vld [vmem:[#allocation5 + $0x18] sm:$0xff]  ;;  %v61_v2 = vld [vmem:[#allocation5 + $0x10] sm:$0xff]  ;;  %v63_v22 = vlaneseq }
  0x26   :  { %293 = vmatprep.subr.mxu0 %v444_v0  ;;  %301 = vmatprep.mubr.msk.f32.mxu0 %vm445_vm0, %v444_v0  ;;  %v157_v3 = vld [vmem:[#allocation7 + $0x78] sm:$0xff]  ;;  %v60_v4 = vld [vmem:[#allocation5 + $0x8] sm:$0xff]  ;;  %v156_v5 = vld [vmem:[#allocation7 + $0x70] sm:$0xff]  ;;  %vm67_vm1 = vcmask 261120  }
  0x27   :  { %304 = vmatprep.subr.mxu1 %v444_v0  ;;  %336 = vmatprep.mubr.msk.f32.mxu1 %vm445_vm0, %v444_v0  ;;  %v155_v6 = vld [vmem:[#allocation7 + $0x68] sm:$0xff]  ;;  %v59_v7 = vld [vmem:[#allocation5] sm:$0xff]  ;;  %v58_v8 = vld [vmem:[#allocation2] sm:$0xff]  ;;  %v64_v23 = vshrl.u32 %v63_v22, 7  ;;  %v233_v47 = vand.u32 127, %v63_v22 }
  0x28   :  { %294 = vmatpush3.msra.mxu0 %v62_v1  ;;  %305 = vmatpush3.msra.mxu1 %v157_v3  ;;  %v154_v9 = vld [vmem:[#allocation7 + $0x60] sm:$0xff]  ;;  %v153_v10 = vld [vmem:[#allocation7 + $0x58] sm:$0xff]  ;;  %v152_v11 = vld [vmem:[#allocation7 + $0x50] sm:$0xff] }
  0x29   :  { %295 = vmatprep.subr.mxu0 %v444_v0  ;;  %306 = vmatprep.subr.mxu1 %v444_v0  ;;  %v151_v12 = vld [vmem:[#allocation7 + $0x48] sm:$0xff]  ;;  %v150_v13 = vld [vmem:[#allocation7 + $0x40] sm:$0xff]  ;;  %v149_v14 = vld [vmem:[#allocation7 + $0x38] sm:$0xff]  ;;  %v65_v24 = vsub.s32 0, %v64_v23  ;;  %v160_v31 = vsub.s32 1, %v64_v23  ;;  %vm234_vm3 = vcmp.lt.s32.totalorder %v233_v47, 4 }
  0x2a   :  { %296 = vmatpush3.msra.mxu0 %v61_v2  ;;  %307 = vmatpush3.msra.mxu1 %v156_v5  ;;  %v148_v15 = vld [vmem:[#allocation7 + $0x30] sm:$0xff]  ;;  %v147_v16 = vld [vmem:[#allocation7 + $0x28] sm:$0xff]  ;;  %v146_v17 = vld [vmem:[#allocation7 + $0x20] sm:$0xff] }
  0x2b   :  { %297 = vmatprep.subr.mxu0 %v444_v0  ;;  %308 = vmatprep.subr.mxu1 %v444_v0  ;;  %v145_v18 = vld [vmem:[#allocation7 + $0x18] sm:$0xff]  ;;  %v144_v19 = vld [vmem:[#allocation7 + $0x10] sm:$0xff]  ;;  %v143_v20 = vld [vmem:[#allocation7 + $0x8] sm:$0xff] }
  0x2c   :  { %298 = vmatpush3.msra.mxu0 %v60_v4  ;;  %309 = vmatpush3.msra.mxu1 %v155_v6  ;;  %v142_v21 = vld [vmem:[#allocation7] sm:$0xff]  ;;  %v57_v25 = vld [vmem:[%s512_s3] sm:$0x3]  ;;  %s446_s3 = smov [#allocation8]  }
  0x2d   :  { %299 = vmatprep.subr.mxu0 %v444_v0  ;;  %310 = vmatprep.subr.mxu1 %v444_v0  ;;  %v66_v26 = vrot.slane %v57_v25, %v65_v24  ;;  %v161_v32 = vrot.slane %v57_v25, %v160_v31  ;;  %s260_s5 = sshll.u32 %s446_s3, 4  ;;  %s261_s5 = int_to_ptr.vmem [resolvable:$true] %s260_s5 }
  0x2e   :  { %300 = vmatpush3.msra.mxu0 %v59_v7  ;;  %311 = vmatpush3.msra.mxu1 %v154_v9  ;;  %s413_s6 = scalar_lea.vmem %s261_s5, 128  ;;  %p418_p2 = scmp.lt.s32.totalorder %s261_s5, %s261_s5 }
  0x2f   :  { %302 = vmatmul.mubr.msk.f32.vlgmr.msra.gmra.mxu0 %vm67_vm1, %v58_v8  ;;  %312 = vmatprep.subr.mxu1 %v444_v0  ;;  %p414_p1 = scmp.ne.s32.totalorder %s261_s5, %s413_s6  ;;  %p419_p3 = scmp.lt.s32.totalorder %s413_s6, %s413_s6 }
  0x30   :  { %313 = vmatpush3.msra.mxu1 %v153_v10 }
  0x31   :  { %314 = vmatprep.subr.mxu1 %v444_v0  ;;  %p420_p4 = por %p419_p3, %p418_p2 }
  0x32   :  { %315 = vmatpush3.msra.mxu1 %v152_v11 }
  0x33   :  { %316 = vmatprep.subr.mxu1 %v444_v0  ;;  %p421_p5 = pnand %p420_p4, %p414_p1 }
  0x34   :  { %317 = vmatpush3.msra.mxu1 %v151_v12 }
  0x35   :  { %318 = vmatprep.subr.mxu1 %v444_v0 }
  0x36   :  { %319 = vmatpush3.msra.mxu1 %v150_v13 }
  0x37   :  { %320 = vmatprep.subr.mxu1 %v444_v0 }
  0x38   :  { %321 = vmatpush3.msra.mxu1 %v149_v14 }
  0x39   :  { %322 = vmatprep.subr.mxu1 %v444_v0 }
  0x3a   :  { %323 = vmatpush3.msra.mxu1 %v148_v15 }
  0x3b   :  { %324 = vmatprep.subr.mxu1 %v444_v0 }
  0x3c   :  { %325 = vmatpush3.msra.mxu1 %v147_v16 }
  0x3d   :  { %326 = vmatprep.subr.mxu1 %v444_v0 }
  0x3e   :  { %327 = vmatpush3.msra.mxu1 %v146_v17 }
  0x3f   :  { %328 = vmatprep.subr.mxu1 %v444_v0 }
  0x40   :  { %329 = vmatpush3.msra.mxu1 %v145_v18 }
  0x41   :  { %330 = vmatprep.subr.mxu1 %v444_v0 }
  0x42   :  { %331 = vmatpush3.msra.mxu1 %v144_v19 }
  0x43   :  { %332 = vmatprep.subr.mxu1 %v444_v0 }
  0x44   :  { %333 = vmatpush3.msra.mxu1 %v143_v20 }
  0x45   :  { %334 = vmatprep.subr.mxu1 %v444_v0 }
  0x46   :  { %335 = vmatpush3.msra.mxu1 %v142_v21 }
  0xef   :  { %v137_v27 = vpop.f32.mrf.mxu0 }
  0xf0   :  { %v138_v28 = vadd.f32 %v137_v27, %v66_v26 }
  0xf1   :  { %v303_v29 = vpop.f32.mrf.mxu0 }
  0xf2   :  { %v141_v30 = vmax.f32 %v138_v28, 0.0 }
  0xf4   :  { %337 = vmatmul.mubr.f32.vlgmr.msra.gmra.mxu1 %v141_v30 }
 0x1b4   :  { %v228_v33 = vpop.f32.mrf.mxu1 }
 0x1b5   :  { %v229_v34 = vadd.f32 %v228_v33, %v161_v32 }
 0x1b6   :  { %v338_v35 = vpop.f32.mrf.mxu1 }
 0x1b7   :  { %v237_v36 = vand.u32 2147483647, %v229_v34  ;;  %v236_v48 = vmax.f32 %v229_v34, 0.0 }
 0x1b9   :  { %v238_v37 = vsub.f32 0.0, %v237_v36 }
 0x1bb   :  { %v239_v38 = vmul.f32 1.442695, %v238_v37 }
 0x1bd   :  { %347 = vpow2.f32 %v239_v38 }
 0x1ca   :  { %v348_v39 = vpop.eup %347 }
 0x1cb   :  { %v241_v40 = vadd.f32 1.0, %v348_v39  ;;  %v244_v41 = vmul.f32 -0.5, %v348_v39  ;;  %v247_v43 = vand.u32 2147483647, %v348_v39 }
 0x1cd   :  { %349 = vlog2.f32 %v241_v40  ;;  %v245_v42 = vadd.f32 1.0, %v244_v41  ;;  %vm248_vm2 = vcmp.lt.f32.partialorder %v247_v43, 0.0004427343 }
 0x1ce   :  { %351 = vtanh.f32 %v229_v34 }
 0x1cf   :  { %v246_v46 = vmul.f32 %v348_v39, %v245_v42 }
 0x1da   :  { %v350_v44 = vpop.eup %349 }
 0x1db   :  { %v243_v45 = vmul.f32 0.6931472, %v350_v44  ;;  %v352_v52 = vpop.eup %351 }
 0x1dd   :  { %v249_v49 = vsel %vm248_vm2, %v246_v46, %v243_v45 }
 0x1de   :  { %v250_v50 = vadd.f32 %v249_v49, %v236_v48 }
 0x1e0   :  { %v251_v51 = vadd.f32 1e-05, %v250_v50 }
 0x1e2   :  { %v252_v53 = vsel %vm234_vm3, %v352_v52, %v251_v51 }
 0x1e3   :  { %253 = vst [vmem:[#allocation8] sm:$0xff] %v252_v53 }
 0x1e4   :  { %424 = shalt.err (!%p421_p5)
}
 0x1e5   :  { %263 = dma.vmem_to_hbm [thread:$0]  %s261_s5, 128, %s513_s4, [#allocation4]  }
 0x1e6   :  { %437 = dma.done.wait [#allocation4], 128  }
 0x1e7   :  { %438 = vsyncadd [#allocation4], 4294967168 }
 0x1e8   :  { %267 = vsyncpa [#allocation3], 1 }
 0x1e9   :  { %268 = vsyncpa [#allocation6], 1 }
 0x1ea   :  { %269 = vsyncpa [#allocation4], 1 }

</bundles_post_ra>
